<compile_context>
chip_gen: v6e
topology: v6e:2x2x1
jax: 0.10.0
libtpu: 0.0.40
codegen_flags: <defaults>
</compile_context>

<pallas_src>
import math

import jax
import jax.numpy as jnp
from jax.experimental import pallas as pl
from jax.experimental.pallas import tpu as pltpu

_C0 = math.sqrt(2.0 / math.pi)          # sqrt(2/pi)
_C1 = _C0 * 0.044715                     # sqrt(2/pi) * 0.044715


def _gelu_kernel(x_ref, o_ref):
    x = x_ref[...]
    xf = x.astype(jnp.float32)           # f32 opmath for half dtypes; no-op for f32
    x2 = xf * xf
    inner = xf * (_C0 + _C1 * x2)        # == sqrt(2/pi) * (x + 0.044715 * x^3)
    y = 0.5 * xf * (1.0 + jnp.tanh(inner))
    o_ref[...] = y.astype(o_ref.dtype)


def _tpu_caps():
    """(vmem_capacity_bytes, num_tensorcores) with safe fallbacks."""
    vmem_bytes = 128 * 1024 * 1024
    num_cores = 1
    try:
        info = pltpu.get_tpu_info()
        v = getattr(info, "vmem_capacity_bytes", None)
        if v:
            vmem_bytes = int(v)
        for attr in ("num_tensorcores", "tensorcore_count", "num_cores", "cores_per_chip"):
            c = getattr(info, attr, None)
            if c:
                num_cores = int(c)
                break
    except Exception:
        pass
    # v7x reports 64 MiB VMEM per TC and has 2 TCs per chip; infer if not reported.
    if num_cores == 1 and vmem_bytes <= 64 * 1024 * 1024:
        num_cores = 2
    return vmem_bytes, num_cores


def _sublane_quantum(dtype) -> int:
    bits = jnp.dtype(dtype).itemsize * 8
    if bits >= 32:
        return 8
    if bits == 16:
        return 16
    return 32


def _pick_cols(n: int, orig_shape) -> int:
    """Lane-dense column count: big multiple of 128 if possible, else a big divisor."""
    for cand in (8192, 4096, 2048, 1024, 512, 256, 128):
        if n % cand == 0:
            return cand
    upper = min(n, 8192)
    for c in range(upper, 255, -1):      # largest divisor of n in [256, 8192]
        if n % c == 0:
            return c
    if len(orig_shape) >= 1 and orig_shape[-1] > 0:
        return orig_shape[-1]            # always divides n
    return 1


def gelu(x: jax.Array) -> jax.Array:
    """Tanh-approx GELU, identical semantics to the PyTorch module's forward."""
    orig_shape = x.shape
    dtype = x.dtype
    n = x.size
    if n == 0:
        return x

    vmem_bytes, num_cores = _tpu_caps()
    if vmem_bytes <= 64 * 1024 * 1024:          # v7x-class: 64 MiB VMEM per TC
        target_block_bytes = 4 * 1024 * 1024
        vmem_limit = 40 * 1024 * 1024
    else:                                        # v5e / v6e: 128 MiB VMEM
        target_block_bytes = 8 * 1024 * 1024
        vmem_limit = 64 * 1024 * 1024
    vmem_limit = min(vmem_limit, vmem_bytes)

    # ---- lane-dense 2D view (layout plumbing only) --------------------------
    cols = _pick_cols(n, orig_shape)
    x2d = x.reshape(-1, cols)
    rows = x2d.shape[0]

    # ---- byte-sized, sublane-aligned row tiling ------------------------------
    itemsize = jnp.dtype(dtype).itemsize
    sub = _sublane_quantum(dtype)
    tile_rows = max(int(target_block_bytes // (cols * itemsize)), 1)
    tile_rows = min(tile_rows, rows)
    if tile_rows >= sub:
        tile_rows -= tile_rows % sub

    # Multi-TC chips: guarantee several balanced grid steps so both cores pipeline.
    if num_cores > 1:
        min_steps = 4 * num_cores
        if pl.cdiv(rows, tile_rows) < min_steps and rows >= min_steps * sub:
            tile_rows = max(sub, ((rows // min_steps) // sub) * sub)

    if tile_rows < sub:
        tile_rows = rows                 # tiny tensor: single full-extent block

    grid = (pl.cdiv(rows, tile_rows),)   # ragged last block masked by Pallas

    out = pl.pallas_call(
        _gelu_kernel,
        out_shape=jax.ShapeDtypeStruct((rows, cols), dtype),
        grid_spec=pltpu.PrefetchScalarGridSpec(
            num_scalar_prefetch=0,
            grid=grid,
            in_specs=[pl.BlockSpec((tile_rows, cols), lambda i: (i, 0))],
            out_specs=pl.BlockSpec((tile_rows, cols), lambda i: (i, 0)),
        ),
        compiler_params=pltpu.CompilerParams(
            dimension_semantics=("parallel",),
            vmem_limit_bytes=vmem_limit,
        ),
    )(x2d)

    return out.reshape(orig_shape)


def _gelu_ref(x):
    xf = x.astype(jnp.float32)
    y = 0.5 * xf * (1.0 + jnp.tanh(_C0 * (xf + 0.044715 * xf**3)))
    return y.astype(x.dtype)


if __name__ == "__main__":
    key = jax.random.PRNGKey(0)
    k1, k2, k3 = jax.random.split(key, 3)

    # Primary: small transformer-activation shape (batch=2, seq=8, hidden=32), f32.
    x = jax.random.normal(k1, (2, 8, 32), dtype=jnp.float32)
    y = jax.block_until_ready(gelu(x))
    assert y.shape == x.shape and y.dtype == x.dtype
    assert jnp.allclose(y, _gelu_ref(x), atol=1e-5, rtol=1e-5)

    # bf16 input: exercises f32 internal opmath and cast-on-store.
    xb = jax.random.normal(k2, (2, 8, 32), dtype=jnp.bfloat16)
    yb = jax.block_until_ready(gelu(xb))
    assert yb.shape == xb.shape and yb.dtype == xb.dtype
    assert jnp.allclose(yb.astype(jnp.float32), _gelu_ref(xb).astype(jnp.float32),
                        atol=2e-2, rtol=2e-2)

    # Odd shape: no factor of 128 -> largest-divisor lane width + ragged row grid.
    x2 = jax.random.normal(k3, (3, 100, 257), dtype=jnp.float32)
    y2 = jax.block_until_ready(gelu(x2))
    assert y2.shape == x2.shape and y2.dtype == x2.dtype
    assert jnp.allclose(y2, _gelu_ref(x2), atol=1e-5, rtol=1e-5)

    print("KERNEL_OK")
</pallas_src>

<mosaic_0001>
module attributes {stable_mosaic.version = 11 : i64} {
  func.func @_gelu_kernel(%arg0: i32, %arg1: memref<1x512xf32, #tpu.memory_space<vmem>>, %arg2: memref<1x512xf32, #tpu.memory_space<vmem>>) attributes {dimension_semantics = [#tpu.dimension_semantics<parallel>], iteration_bounds = array<i64: 1>, scalar_prefetch = 0 : i64, scratch_operands = 0 : i64, tpu.core_type = #tpu.core_type<tc>, window_params = [{transform_indices = @transform_0, window_bounds = array<i64: 1, 512>}, {transform_indices = @transform_1, window_bounds = array<i64: 1, 512>}]} {
    %c0 = arith.constant 0 : index
    %c0_0 = arith.constant 0 : index
    %0 = vector.load %arg1[%c0, %c0_0] : memref<1x512xf32, #tpu.memory_space<vmem>>, vector<1x512xf32>
    %1 = arith.mulf %0, %0 : vector<1x512xf32>
    %cst = arith.constant 0.0356774069 : f32
    %2 = vector.broadcast %cst : f32 to vector<1x512xf32>
    %3 = arith.mulf %2, %1 : vector<1x512xf32>
    %cst_1 = arith.constant 0.797884583 : f32
    %4 = vector.broadcast %cst_1 : f32 to vector<1x512xf32>
    %5 = arith.addf %4, %3 : vector<1x512xf32>
    %6 = arith.mulf %0, %5 : vector<1x512xf32>
    %cst_2 = arith.constant 5.000000e-01 : f32
    %7 = vector.broadcast %cst_2 : f32 to vector<1x512xf32>
    %8 = arith.mulf %7, %0 : vector<1x512xf32>
    %9 = math.tanh %6 : vector<1x512xf32>
    %cst_3 = arith.constant 1.000000e+00 : f32
    %10 = vector.broadcast %cst_3 : f32 to vector<1x512xf32>
    %11 = arith.addf %10, %9 : vector<1x512xf32>
    %12 = arith.mulf %8, %11 : vector<1x512xf32>
    %c0_4 = arith.constant 0 : index
    %c0_5 = arith.constant 0 : index
    %13 = vector.load %arg2[%c0_4, %c0_5] : memref<1x512xf32, #tpu.memory_space<vmem>>, vector<1x512xf32>
    tpu.vector_store %arg2[%c0_4, %c0_5], %12 {strides = array<i32>} : memref<1x512xf32, #tpu.memory_space<vmem>>, vector<1x512xf32>,
    return
  }
  func.func @transform_0(%arg0: i32) -> (i32, i32) {
    %c0_i32 = arith.constant 0 : i32
    %c0_i32_0 = arith.constant 0 : i32
    return %arg0, %c0_i32 : i32, i32
  }
  func.func @transform_1(%arg0: i32) -> (i32, i32) {
    %c0_i32 = arith.constant 0 : i32
    %c0_i32_0 = arith.constant 0 : i32
    return %arg0, %c0_i32 : i32, i32
  }
}

</mosaic_0001>

<bundles_post_ra>
// kernel: tpu_custom_call.1
= control target key start
LH: loop header
LB: loop body
LE: loop exit
PB: predicated region body
PF: predicated region fallthrough
CT: control target
= control target key end

     0   :  { %6 = vsyncpa [#allocation3], 0  ;;  %s116_s0 = inlined_call_operand.hbm [shape: f32[1,512], index: 0, kind: input, shape index: {}]   ;;  %s117_s1 = inlined_call_operand.hbm [shape: f32[1,512], index: 1, kind: output, shape index: {}]  }
   0x1   :  { %7 = vsyncpa [#allocation4], 0  ;;  %s98_s6 = smov [#allocation2]  }
   0x2   :  { %s14_s7 = sshll.u32 %s98_s6, 4  ;;  %s15_s7 = int_to_ptr.vmem [resolvable:$true] %s14_s7 }
   0x3   :  { %s62_s8 = scalar_lea.vmem %s15_s7, 64  ;;  %p67_p1 = scmp.lt.s32.totalorder %s15_s7, %s15_s7 }
   0x4   :  { %p63_p0 = scmp.ne.s32.totalorder %s15_s7, %s62_s8  ;;  %p68_p2 = scmp.lt.s32.totalorder %s62_s8, %s62_s8 }
   0x6   :  { %p69_p3 = por %p68_p2, %p67_p1 }
   0x8   :  { %p70_p4 = pnand %p69_p3, %p63_p0 }
   0xa   :  { %73 = shalt.err (!%p70_p4)
}
   0xb   :  { %17 = dma.hbm_to_vmem [thread:$0]  %s116_s0, 64, %s15_s7, [#allocation3]  }
   0xc   :  { %94 = dma.done.wait [#allocation3], 64  }
   0xd   :  { %95 = vsyncadd [#allocation3], 4294967232  ;;  %v21_v0 = vld [vmem:[#allocation2] sm:$0xf]  ;;  %v30_v5 = vlaneseq  ;;  %s99_s11 = smov [#allocation5]  }
   0xe   :  { %v22_v1 = vmul.f32 %v21_v0, %v21_v0  ;;  %v26_v6 = vmul.f32 0.5, %v21_v0  ;;  %s41_s12 = sshll.u32 %s99_s11, 4  ;;  %s42_s12 = int_to_ptr.vmem [resolvable:$true] %s41_s12 }
   0xf   :  { %vm32_vm0 = vcmp.lt.s32.totalorder %v30_v5, 512  ;;  %s74_s13 = scalar_lea.vmem %s42_s12, 64  ;;  %p79_p6 = scmp.lt.s32.totalorder %s42_s12, %s42_s12 }
  0x10   :  { %v23_v2 = vmul.f32 0.035677407, %v22_v1  ;;  %p75_p5 = scmp.ne.s32.totalorder %s42_s12, %s74_s13  ;;  %p80_p7 = scmp.lt.s32.totalorder %s74_s13, %s74_s13 }
  0x12   :  { %v24_v3 = vadd.f32 0.7978846, %v23_v2  ;;  %p81_p8 = por %p80_p7, %p79_p6 }
  0x14   :  { %v25_v4 = vmul.f32 %v24_v3, %v21_v0  ;;  %p82_p9 = pnand %p81_p8, %p75_p5 }
  0x16   :  { %52 = vtanh.f32 %v25_v4 }
  0x23   :  { %v53_v7 = vpop.eup %52 }
  0x24   :  { %v28_v8 = vadd.f32 1.0, %v53_v7 }
  0x26   :  { %v29_v9 = vmul.f32 %v28_v8, %v26_v6 }
  0x28   :  { %34 = vst.msk [vmem:[#allocation5] sm:$0xf] %vm32_vm0, %v29_v9 }
  0x29   :  { %85 = shalt.err (!%p82_p9)
}
  0x2a   :  { %44 = dma.vmem_to_hbm [thread:$0]  %s42_s12, 64, %s117_s1, [#allocation4]  }
  0x2b   :  { %96 = dma.done.wait [#allocation4], 64  }
  0x2c   :  { %97 = vsyncadd [#allocation4], 4294967232 }
  0x2d   :  { %48 = vsyncpa [#allocation3], 1 }
  0x2e   :  { %49 = vsyncpa [#allocation4], 1 }

</bundles_post_ra>
